<compile_context>
chip_gen: v7x
topology: tpu7x:2x2x1
jax: 0.10.0
libtpu: 0.0.40
codegen_flags: <defaults>
</compile_context>

<pallas_src>
import functools

import jax
import jax.numpy as jnp
from jax.experimental import pallas as pl
from jax.experimental.pallas import tpu as pltpu


def _ffn_kernel(x_ref, w1_ref, b1_ref, w2_ref, b2_ref, o_ref, acc_ref, *,
                approximate_gelu):
    # x_ref : (tm, E)          row tile (resident across the h axis)
    # w1_ref: (E, th)          streamed W1 column block
    # b1_ref: (grid_h, 1, th)  f32, resident (constant index_map)
    # w2_ref: (th, E)          streamed W2 row block
    # b2_ref: (1, E)           f32, resident
    # o_ref : (tm, E)          output tile (same block across the h axis)
    # acc_ref: (tm, E)         f32 accumulator scratch
    h_idx = pl.program_id(1)

    @pl.when(h_idx == 0)
    def _():
        acc_ref[...] = jnp.zeros_like(acc_ref)

    # First matmul contracts the full E axis, producing one hidden block, so the
    # bias add + GELU are exact per block (elementwise).  f32 accumulation.
    h = jnp.dot(x_ref[...], w1_ref[...], preferred_element_type=jnp.float32)
    h = h + b1_ref[h_idx]
    # tanh GELU routes the transcendental to the EUP slot (free next to MXU).
    # approximate_gelu=False gives PyTorch nn.GELU's exact erf (VPU polynomial);
    # only select it when strict parity is required.
    h = jax.nn.gelu(h, approximate=approximate_gelu)

    # Second matmul: partial product over this hidden block, accumulated in f32.
    acc_ref[...] += jnp.dot(h.astype(w2_ref.dtype), w2_ref[...],
                            preferred_element_type=jnp.float32)

    @pl.when(h_idx == pl.num_programs(1) - 1)
    def _():
        # b2 added exactly once, at finalize.
        o_ref[...] = (acc_ref[...] + b2_ref[...]).astype(o_ref.dtype)


def _round_up(a, b):
    return -(-a // b) * b


def _tpu_vmem_capacity_bytes():
    try:
        return int(pltpu.get_tpu_info().vmem_capacity_bytes)
    except Exception:
        return 64 << 20  # conservative fallback (smallest current part, v7x)


def _pick_th(H, target):
    """Largest multiple of 128 <= target that divides H; else H (fully resident)."""
    if H <= target:
        return H
    t = (min(target, H) // 128) * 128
    while t >= 128:
        if H % t == 0:
            return t
        t -= 128
    return H


def _footprint_bytes(tm, th, E, H, op_itemsize, out_itemsize):
    # Double-buffered x / W1 / W2 / out tiles + resident f32 accumulator and
    # biases + ~4 MiB of compiler-internal headroom.
    dbuf = 2 * ((tm * E + E * th + th * E) * op_itemsize + tm * E * out_itemsize)
    resident = tm * E * 4 + (H + E) * 4
    return dbuf + resident + (4 << 20)


def _choose_tiles(M, H, E, op_itemsize, out_itemsize, vmem_cap, tm_req, th_req):
    # Leave >= 16 MiB of headroom below physical VMEM (never budget the full
    # 64/128 MiB), but never below the 32 MiB default scoped limit.
    budget = max(32 << 20, vmem_cap - (16 << 20))
    if vmem_cap >= (96 << 20):          # v5e / v6e (128 MiB VMEM per core)
        tm_d, th_d = 768, 512
    else:                               # v7x (64 MiB VMEM per core)
        tm_d, th_d = 512, 256
    tm_req = tm_d if tm_req is None else tm_req
    th_req = th_d if th_req is None else th_req

    th = _pick_th(H, th_req)
    tm = min(_round_up(tm_req, 8), _round_up(M, 8))
    if M > 8 and tm >= M:
        # Keep at least two row blocks so the "parallel" axis can shard across
        # both v7x TensorCores; at most one extra grid step elsewhere.
        tm = max(8, ((M // 2) // 8) * 8)

    # Shrink until the double-buffered working set fits the budget
    # (th first: it costs no arithmetic intensity).
    while _footprint_bytes(tm, th, E, H, op_itemsize, out_itemsize) > budget:
        new_th = _pick_th(H, th // 2) if th > 128 else th
        if new_th < th:
            th = new_th
        elif tm > 8:
            tm = max(8, ((tm // 2) // 8) * 8)
        else:
            break
    return tm, th, budget


def feed_forward(x, w1, b1, w2, b2, *, tm=None, th=None,
                 compute_dtype=jnp.bfloat16, approximate_gelu=True):
    """x: (B, T, E). Returns (B, T, E) in x's dtype.

    compute_dtype: MXU operand dtype (default bf16). Accumulation, bias adds and
    the activation stay in float32. Pass weights already stored in this dtype to
    avoid a per-call cast pass over them.
    approximate_gelu: True -> tanh GELU (EUP path, perf default),
                      False -> exact erf GELU (PyTorch nn.GELU default).
    """
    B, T, E = x.shape
    H = w1.shape[1]                         # 4 * E
    M = B * T

    out_dtype = x.dtype
    op_dtype = jnp.dtype(x.dtype if compute_dtype is None else compute_dtype)
    # Cast only when needed; keep weights in bf16 at rest upstream.
    if x.dtype != op_dtype:
        x = x.astype(op_dtype)
    if w1.dtype != op_dtype:
        w1 = w1.astype(op_dtype)
    if w2.dtype != op_dtype:
        w2 = w2.astype(op_dtype)

    op_itemsize = jnp.dtype(op_dtype).itemsize
    out_itemsize = jnp.dtype(out_dtype).itemsize
    vmem_cap = _tpu_vmem_capacity_bytes()
    tm, th, budget = _choose_tiles(M, H, E, op_itemsize, out_itemsize,
                                   vmem_cap, tm, th)

    M_pad = _round_up(M, tm)
    grid_m = M_pad // tm
    grid_h = H // th

    x2d = x.reshape(M, E)
    if M_pad != M:
        x2d = jnp.pad(x2d, ((0, M_pad - M), (0, 0)))

    b1_blk = b1.astype(jnp.float32).reshape(grid_h, 1, th)
    b2_2d = b2.astype(jnp.float32).reshape(1, E)

    need = _footprint_bytes(tm, th, E, H, op_itemsize, out_itemsize)
    vmem_limit = int(max(min(budget, max(need, 32 << 20)), need))

    cost = pl.CostEstimate(
        flops=4 * M_pad * E * H,                 # two matmuls, 2*M*E*H each
        transcendentals=M_pad * H,               # one tanh/erf per hidden element
        bytes_accessed=(x2d.nbytes + M_pad * E * out_itemsize
                        + (w1.nbytes + w2.nbytes) * grid_m
                        + b1_blk.nbytes + b2_2d.nbytes),
    )

    kernel = functools.partial(_ffn_kernel, approximate_gelu=approximate_gelu)

    out2d = pl.pallas_call(
        kernel,
        out_shape=jax.ShapeDtypeStruct((M_pad, E), out_dtype),
        grid_spec=pltpu.PrefetchScalarGridSpec(
            num_scalar_prefetch=0,
            grid=(grid_m, grid_h),
            in_specs=[
                pl.BlockSpec((tm, E), lambda i, h: (i, 0)),             # x rows
                pl.BlockSpec((E, th), lambda i, h: (0, h)),             # W1 cols
                pl.BlockSpec((grid_h, 1, th), lambda i, h: (0, 0, 0)),  # b1 (resident)
                pl.BlockSpec((th, E), lambda i, h: (h, 0)),             # W2 rows
                pl.BlockSpec((1, E), lambda i, h: (0, 0)),              # b2 (resident)
            ],
            out_specs=pl.BlockSpec((tm, E), lambda i, h: (i, 0)),
            scratch_shapes=[pltpu.VMEM((tm, E), jnp.float32)],
        ),
        compiler_params=pltpu.CompilerParams(
            dimension_semantics=("parallel", "arbitrary"),
            vmem_limit_bytes=vmem_limit,
        ),
        cost_estimate=cost,
    )(x2d, w1, b1_blk, w2, b2_2d)

    return out2d[:M].reshape(B, T, E)


def init_params(key, emb_size):
    """Deterministic init mirroring nn.Linear's default (uniform +/- 1/sqrt(fan_in))."""
    h = emb_size * 4
    k1, k2, k3, k4 = jax.random.split(key, 4)
    bound1 = 1.0 / (emb_size ** 0.5)
    bound2 = 1.0 / (h ** 0.5)
    w1 = jax.random.uniform(k1, (emb_size, h), jnp.float32, -bound1, bound1)
    b1 = jax.random.uniform(k2, (h,), jnp.float32, -bound1, bound1)
    w2 = jax.random.uniform(k3, (h, emb_size), jnp.float32, -bound2, bound2)
    b2 = jax.random.uniform(k4, (emb_size,), jnp.float32, -bound2, bound2)
    return w1, b1, w2, b2


if __name__ == "__main__":
    # small shapes: batch=2, seq=8, emb=32  (hidden = 4*emb = 128)
    B, T, E = 2, 8, 32
    key = jax.random.PRNGKey(0)
    kx, kp, kx2 = jax.random.split(key, 3)
    x = jax.random.normal(kx, (B, T, E), jnp.float32)
    w1, b1, w2, b2 = init_params(kp, E)

    def ref_fn(xx, ww1, ww2):
        h = jax.nn.gelu(xx.reshape(-1, E) @ ww1 + b1, approximate=True)
        return (h @ ww2 + b2).reshape(xx.shape)

    # 1) f32 compute path (tanh GELU), tight tolerance.
    out = jax.block_until_ready(feed_forward(x, w1, b1, w2, b2, compute_dtype=None))
    assert out.shape == (B, T, E)
    assert jnp.allclose(out, ref_fn(x, w1, w2), atol=1e-5, rtol=1e-5)

    # 2) default perf path: bf16 weights at rest + bf16 MXU operands, f32 accum.
    w1_bf, w2_bf = w1.astype(jnp.bfloat16), w2.astype(jnp.bfloat16)
    out_bf = jax.block_until_ready(feed_forward(x, w1_bf, b1, w2_bf, b2))
    r = lambda a: a.astype(jnp.bfloat16).astype(jnp.float32)
    h_ref = jax.nn.gelu(r(x).reshape(-1, E) @ r(w1) + b1, approximate=True)
    ref_bf = (r(h_ref) @ r(w2) + b2).reshape(B, T, E)
    assert out_bf.shape == (B, T, E)
    assert jnp.allclose(out_bf, ref_bf, atol=2e-2, rtol=2e-2)

    # 3) ragged row count (B*T = 14 not a multiple of the row tile) exercises
    #    the zero-pad / slice-back path.
    x_rag = jax.random.normal(kx2, (2, 7, E), jnp.float32)
    out_rag = jax.block_until_ready(
        feed_forward(x_rag, w1, b1, w2, b2, compute_dtype=None))
    assert out_rag.shape == (2, 7, E)
    assert jnp.allclose(out_rag, ref_fn(x_rag, w1, w2), atol=1e-5, rtol=1e-5)

    print("KERNEL_OK")
</pallas_src>

<mosaic_0001>
module attributes {stable_mosaic.version = 11 : i64} {
  func.func @_ffn_kernel(%arg0: i32, %arg1: i32, %arg2: memref<8x32xf32, #tpu.memory_space<vmem>>, %arg3: memref<32x128xf32, #tpu.memory_space<vmem>>, %arg4: memref<1x1x128xf32, #tpu.memory_space<vmem>>, %arg5: memref<128x32xf32, #tpu.memory_space<vmem>>, %arg6: memref<1x32xf32, #tpu.memory_space<vmem>>, %arg7: memref<8x32xf32, #tpu.memory_space<vmem>>, %arg8: memref<8x32xf32, #tpu.memory_space<vmem>>) attributes {dimension_semantics = [#tpu.dimension_semantics<parallel>, #tpu.dimension_semantics<arbitrary>], iteration_bounds = array<i64: 2, 1>, scalar_prefetch = 0 : i64, scratch_operands = 1 : i64, tpu.core_type = #tpu.core_type<tc>, window_params = [{transform_indices = @transform_0, window_bounds = array<i64: 8, 32>}, {transform_indices = @transform_1, window_bounds = array<i64: 32, 128>}, {pipeline_mode = #tpu.pipeline_mode<synchronous>, transform_indices = @transform_2, window_bounds = array<i64: 1, 1, 128>}, {transform_indices = @transform_3, window_bounds = array<i64: 128, 32>}, {pipeline_mode = #tpu.pipeline_mode<synchronous>, transform_indices = @transform_4, window_bounds = array<i64: 1, 32>}, {transform_indices = @transform_5, window_bounds = array<i64: 8, 32>}]} {
    %c0_i32 = arith.constant 0 : i32
    %0 = arith.cmpi eq, %arg1, %c0_i32 : i32
    %1 = arith.extui %0 : i1 to i32
    %c0_i32_0 = arith.constant 0 : i32
    %2 = arith.cmpi ne, %1, %c0_i32_0 : i32
    scf.if %2 {
      %cst_19 = arith.constant 0.000000e+00 : f32
      %32 = vector.broadcast %cst_19 : f32 to vector<8x32xf32>
      %c0_20 = arith.constant 0 : index
      %c0_21 = arith.constant 0 : index
      %33 = vector.load %arg8[%c0_20, %c0_21] : memref<8x32xf32, #tpu.memory_space<vmem>>, vector<8x32xf32>
      tpu.vector_store %arg8[%c0_20, %c0_21], %32 {strides = array<i32>} : memref<8x32xf32, #tpu.memory_space<vmem>>, vector<8x32xf32>,
    } else {
    }
    %c0 = arith.constant 0 : index
    %c0_1 = arith.constant 0 : index
    %3 = vector.load %arg2[%c0, %c0_1] : memref<8x32xf32, #tpu.memory_space<vmem>>, vector<8x32xf32>
    %c0_2 = arith.constant 0 : index
    %c0_3 = arith.constant 0 : index
    %4 = vector.load %arg3[%c0_2, %c0_3] : memref<32x128xf32, #tpu.memory_space<vmem>>, vector<32x128xf32>
    %cst = arith.constant dense<0.000000e+00> : vector<8x128xf32>
    %5 = tpu.matmul %3, %4, %cst {dimension_numbers = #tpu.dot_dimension_numbers<[1], [0], [0], [1], [0, 0, 1, 1], [], []>} : vector<8x32xf32>, vector<32x128xf32>, vector<8x128xf32> -> vector<8x128xf32>
    %6 = arith.index_cast %arg1 : i32 to index
    %c0_4 = arith.constant 0 : index
    %c0_5 = arith.constant 0 : index
    %7 = vector.load %arg4[%6, %c0_4, %c0_5] : memref<1x1x128xf32, #tpu.memory_space<vmem>>, vector<1x1x128xf32>
    %8 = vector.shape_cast %7 : vector<1x1x128xf32> to vector<1x128xf32>
    %9 = vector.broadcast %8 : vector<1x128xf32> to vector<8x128xf32>
    %10 = arith.addf %5, %9 : vector<8x128xf32>
    %11 = arith.mulf %10, %10 : vector<8x128xf32>
    %12 = arith.mulf %10, %11 : vector<8x128xf32>
    %cst_6 = arith.constant 4.471500e-02 : f32
    %13 = vector.broadcast %cst_6 : f32 to vector<8x128xf32>
    %14 = arith.mulf %13, %12 : vector<8x128xf32>
    %15 = arith.addf %10, %14 : vector<8x128xf32>
    %cst_7 = arith.constant 0.797884583 : f32
    %16 = vector.broadcast %cst_7 : f32 to vector<8x128xf32>
    %17 = arith.mulf %16, %15 : vector<8x128xf32>
    %18 = math.tanh %17 : vector<8x128xf32>
    %cst_8 = arith.constant 1.000000e+00 : f32
    %19 = vector.broadcast %cst_8 : f32 to vector<8x128xf32>
    %20 = arith.addf %19, %18 : vector<8x128xf32>
    %cst_9 = arith.constant 5.000000e-01 : f32
    %21 = vector.broadcast %cst_9 : f32 to vector<8x128xf32>
    %22 = arith.mulf %21, %20 : vector<8x128xf32>
    %23 = arith.mulf %10, %22 : vector<8x128xf32>
    %c0_10 = arith.constant 0 : index
    %c0_11 = arith.constant 0 : index
    %24 = vector.load %arg8[%c0_10, %c0_11] : memref<8x32xf32, #tpu.memory_space<vmem>>, vector<8x32xf32>
    %c0_12 = arith.constant 0 : index
    %c0_13 = arith.constant 0 : index
    %25 = vector.load %arg5[%c0_12, %c0_13] : memref<128x32xf32, #tpu.memory_space<vmem>>, vector<128x32xf32>
    %cst_14 = arith.constant dense<0.000000e+00> : vector<8x32xf32>
    %26 = tpu.matmul %23, %25, %cst_14 {dimension_numbers = #tpu.dot_dimension_numbers<[1], [0], [0], [1], [0, 0, 1, 1], [], []>} : vector<8x128xf32>, vector<128x32xf32>, vector<8x32xf32> -> vector<8x32xf32>
    %27 = arith.addf %24, %26 : vector<8x32xf32>
    %c0_15 = arith.constant 0 : index
    %c0_16 = arith.constant 0 : index
    %28 = vector.load %arg8[%c0_15, %c0_16] : memref<8x32xf32, #tpu.memory_space<vmem>>, vector<8x32xf32>
    tpu.vector_store %arg8[%c0_15, %c0_16], %27 {strides = array<i32>} : memref<8x32xf32, #tpu.memory_space<vmem>>, vector<8x32xf32>,
    %c0_i32_17 = arith.constant 0 : i32
    %29 = arith.cmpi eq, %arg1, %c0_i32_17 : i32
    %30 = arith.extui %29 : i1 to i32
    %c0_i32_18 = arith.constant 0 : i32
    %31 = arith.cmpi ne, %30, %c0_i32_18 : i32
    scf.if %31 {
      %c0_19 = arith.constant 0 : index
      %c0_20 = arith.constant 0 : index
      %32 = vector.load %arg8[%c0_19, %c0_20] : memref<8x32xf32, #tpu.memory_space<vmem>>, vector<8x32xf32>
      %c0_21 = arith.constant 0 : index
      %c0_22 = arith.constant 0 : index
      %33 = vector.load %arg6[%c0_21, %c0_22] : memref<1x32xf32, #tpu.memory_space<vmem>>, vector<1x32xf32>
      %34 = vector.broadcast %33 : vector<1x32xf32> to vector<8x32xf32>
      %35 = arith.addf %32, %34 : vector<8x32xf32>
      %c0_23 = arith.constant 0 : index
      %c0_24 = arith.constant 0 : index
      %36 = vector.load %arg7[%c0_23, %c0_24] : memref<8x32xf32, #tpu.memory_space<vmem>>, vector<8x32xf32>
      tpu.vector_store %arg7[%c0_23, %c0_24], %35 {strides = array<i32>} : memref<8x32xf32, #tpu.memory_space<vmem>>, vector<8x32xf32>,
    } else {
    }
    return
  }
  func.func @transform_0(%arg0: i32, %arg1: i32) -> (i32, i32) {
    %c0_i32 = arith.constant 0 : i32
    %c0_i32_0 = arith.constant 0 : i32
    return %arg0, %c0_i32 : i32, i32
  }
  func.func @transform_1(%arg0: i32, %arg1: i32) -> (i32, i32) {
    %c0_i32 = arith.constant 0 : i32
    %c0_i32_0 = arith.constant 0 : i32
    return %c0_i32, %arg1 : i32, i32
  }
  func.func @transform_2(%arg0: i32, %arg1: i32) -> (i32, i32, i32) {
    %c0_i32 = arith.constant 0 : i32
    %c0_i32_0 = arith.constant 0 : i32
    %c0_i32_1 = arith.constant 0 : i32
    %c0_i32_2 = arith.constant 0 : i32
    return %c0_i32, %c0_i32_0, %c0_i32_1 : i32, i32, i32
  }
  func.func @transform_3(%arg0: i32, %arg1: i32) -> (i32, i32) {
    %c0_i32 = arith.constant 0 : i32
    %c0_i32_0 = arith.constant 0 : i32
    return %arg1, %c0_i32 : i32, i32
  }
  func.func @transform_4(%arg0: i32, %arg1: i32) -> (i32, i32) {
    %c0_i32 = arith.constant 0 : i32
    %c0_i32_0 = arith.constant 0 : i32
    %c0_i32_1 = arith.constant 0 : i32
    return %c0_i32, %c0_i32_0 : i32, i32
  }
  func.func @transform_5(%arg0: i32, %arg1: i32) -> (i32, i32) {
    %c0_i32 = arith.constant 0 : i32
    %c0_i32_0 = arith.constant 0 : i32
    return %arg0, %c0_i32 : i32, i32
  }
}

</mosaic_0001>

<bundles_post_ra>
// kernel: tpu_custom_call.1
= control target key start
LH: loop header
LB: loop body
LE: loop exit
PB: predicated region body
PF: predicated region fallthrough
CT: control target
= control target key end

     0   :  { %10 = vsyncpa [#allocation4], 0  ;;  %s1057_s0 = inlined_call_operand.vmem [shape: f32[16,32], index: 0, kind: input, shape index: {}]   ;;  %s1058_s1 = inlined_call_operand.vmem [shape: f32[32,128], index: 1, kind: input, shape index: {}]   ;;  %s1059_s2 = inlined_call_operand.vmem [shape: f32[1,1,128], index: 2, kind: input, shape index: {}]   ;;  %s1060_s3 = inlined_call_operand.vmem [shape: f32[128,32], index: 3, kind: input, shape index: {}]   ;;  %s1061_s4 = inlined_call_operand.vmem [shape: f32[1,32], index: 4, kind: input, shape index: {}]   ;;  %s1062_s5 = inlined_call_operand.hbm [shape: f32[16,32], index: 5, kind: output, shape index: {}]  }
   0x1   :  { %12 = vsyncpa [#allocation4 + $0x1], 0  ;;  %s875_s18 = smov 0   ;;  %s877_s19 = smov 0  }
   0x2   :  { %s879_s20 = smov 0   ;;  %s881_s21 = smov 0  }
   0x3   :  { %s883_s22 = smov 0   ;;  %s885_s23 = smov 0  }
   0x4 LB: > { %s587_s24 = sadd.s32 4294967295, %s839_s23   ;;  %s588_s25 = sadd.s32 4294967294, %s839_s23   ;;  %s839_s23 = sphi %s885_s23, %s18_s23   ;;  %s835_s22 = sphi %s883_s22, %s1069_s22   ;;  %s831_s21 = sphi %s881_s21, %s1068_s21   ;;  %s827_s20 = sphi %s879_s20, %s1067_s20   ;;  %s823_s19 = sphi %s877_s19, %s1066_s19   ;;  %s819_s18 = sphi %s875_s18, %s1065_s18  }
   0x5   : > { %s30_s26 = sadd.s32 1, %s835_s22  ;;  %s157_s27 = sadd.s32 1, %s827_s20 }
   0x6   : > { %p32_p0 = scmp.ge.s32.totalorder %s30_s26, 2  ;;  %p167_p1 = scmp.ne.s32.totalorder %s827_s20, %s823_s19 }
   0x7   : > { %p168_p2 = scmp.eq.s32.totalorder %s587_s24, 1  ;;  %p173_p3 = scmp.ne.s32.totalorder %s823_s19, %s819_s18 }
   0x8   : > { %s1071_s26 = smov (%p32_p0, %s30_s26), 0  ;;  %p174_p5 = scmp.eq.s32.totalorder %s588_s25, 1 }
   0x9   : > { %p915_p4 = por %p168_p2, %p167_p1  ;;  %s154_s29 = ssub.s32 %s835_s22, %s1071_s26 }
   0xa   : > { %p593_p6 = scmp.ge.s32.totalorder %s839_s23, 1  ;;  %p155_p7 = scmp.eq.s32.totalorder %s154_s29, 0 }
   0xb   : > { %p922_p8 = por %p174_p5, %p173_p3  ;;  %p221_p9 = scmp.lt.s32.totalorder %s839_s23, 3 }
   0xc   : > { %s928_s6 = scalar_select %p155_p7, %s827_s20, %s157_s27  }
   0xd   : > { %p222_p10 = pnand %p593_p6, %p221_p9 }
   0xe   : > { %v278_v0 = vld [vmem:[%s1058_s1] sm:$0xff] (!%p222_p10)  ;;  %v279_v1 = vld [vmem:[%s1058_s1 + $0x8] sm:$0xff] (!%p222_p10)  ;;  %v280_v2 = vld [vmem:[%s1058_s1 + $0x10] sm:$0xff] (!%p222_p10)  ;;  %v841_v3 = vmov (!%p222_p10), 0.0|0.0   ;;  %vm842_vm0 = vmmov (!%p222_p10), 0   ;;  %v843_v6 = vmov (!%p222_p10), 0.0  }
   0xf   : > { %225 = sbr.rel (%p222_p10) target bundleno = 506 (0x1fa), region = 40  ;;  %671 = vmatprep.subr.bf16.mxu0 (!%p222_p10), %v841_v3  ;;  %v672_v4 = vpack.c.bf16 (!%p222_p10), %v279_v1, %v278_v0  ;;  %v281_v5 = vld [vmem:[%s1058_s1 + $0x18] sm:$0xff] (!%p222_p10)  ;;  %633 = vmatprep.mubr.msk.f32.mxu0 (!%p222_p10), %vm842_vm0, %v843_v6  ;;  %p257_p11 = scmp.lt.s32.totalorder (!%p222_p10), %s831_s21, 1  ;;  %vm275_vm1 = vcmask (!%p222_p10), 261120   ;;  %v374_v7 = vld [vmem:[%s1060_s3] sm:$0xff] (!%p222_p10)  ;;  %v375_v8 = vld [vmem:[%s1060_s3 + $0x8] sm:$0xff] (!%p222_p10) }
  0x10   : > { %276 = vst.msk [vmem:[#allocation2] sm:$0xff] (!%p222_p10), %vm275_vm1, %v843_v6  ;;  %677 = vmatprep.subr.bf16.mxu1 (!%p222_p10), %v841_v3  ;;  %v678_v9 = vpack.c.bf16 (!%p222_p10), %v375_v8, %v374_v7  ;;  %668 = vmatprep.mubr.msk.f32.mxu1 (!%p222_p10), %vm842_vm0, %v843_v6  ;;  %v675_v10 = vpack.c.bf16 (!%p222_p10), %v281_v5, %v280_v2  ;;  %v376_v12 = vld [vmem:[%s1060_s3 + $0x10] sm:$0xff] (!%p222_p10)  ;;  %v377_v13 = vld [vmem:[%s1060_s3 + $0x18] sm:$0xff] (!%p222_p10)  ;;  %v378_v15 = vld [vmem:[%s1060_s3 + $0x20] sm:$0xff] (!%p222_p10)  ;;  %s254_s9 = sand.u32 (!%p222_p10), 1, %s823_s19   ;;  %s600_s13 = sshll.u32 (!%p222_p10), %s831_s21, 7 }
  0x11   : > { %673 = vmatpush3.bf16.msra.mxu0 (!%p222_p10), %v672_v4  ;;  %v681_v14 = vpack.c.bf16 (!%p222_p10), %v377_v13, %v376_v12  ;;  %v379_v16 = vld [vmem:[%s1060_s3 + $0x28] sm:$0xff] (!%p222_p10)  ;;  %v380_v18 = vld [vmem:[%s1060_s3 + $0x30] sm:$0xff] (!%p222_p10)  ;;  %v381_v19 = vld [vmem:[%s1060_s3 + $0x38] sm:$0xff] (!%p222_p10)  ;;  %s594_s10 = sshll.u32 (!%p222_p10), %s254_s9, 3  ;;  %s1009_s24 = scalar_lea.hbm (!%p222_p10), %s1062_s5, %s600_s13 }
  0x12   : > { %674 = vmatprep.subr.bf16.mxu0 (!%p222_p10), %v841_v3  ;;  %679 = vmatpush3.bf16.msra.mxu1 (!%p222_p10), %v678_v9  ;;  %v684_v17 = vpack.c.bf16 (!%p222_p10), %v379_v16, %v378_v15  ;;  %v687_v20 = vpack.c.bf16 (!%p222_p10), %v381_v19, %v380_v18  ;;  %v382_v21 = vld [vmem:[%s1060_s3 + $0x40] sm:$0xff] (!%p222_p10)  ;;  %v383_v22 = vld [vmem:[%s1060_s3 + $0x48] sm:$0xff] (!%p222_p10)  ;;  %v384_v24 = vld [vmem:[%s1060_s3 + $0x50] sm:$0xff] (!%p222_p10)  ;;  %s256_s14 = scalar_lea.vmem (!%p222_p10), [#allocation3], %s594_s10 }
  0x13   : > { %680 = vmatprep.subr.bf16.mxu1 (!%p222_p10), %v841_v3  ;;  %v690_v23 = vpack.c.bf16 (!%p222_p10), %v383_v22, %v382_v21  ;;  %v385_v25 = vld [vmem:[%s1060_s3 + $0x58] sm:$0xff] (!%p222_p10)  ;;  %v386_v27 = vld [vmem:[%s1060_s3 + $0x60] sm:$0xff] (!%p222_p10)  ;;  %v387_v28 = vld [vmem:[%s1060_s3 + $0x68] sm:$0xff] (!%p222_p10)  ;;  %s489_s15 = sshll.u32 (!%p222_p10), %s256_s14, 4  ;;  %s1011_s15 = int_to_ptr.vmem [resolvable:$true] %s489_s15 }
  0x14   : > { %v693_v26 = vpack.c.bf16 (!%p222_p10), %v385_v25, %v384_v24  ;;  %v696_v29 = vpack.c.bf16 (!%p222_p10), %v387_v28, %v386_v27  ;;  %v388_v30 = vld [vmem:[%s1060_s3 + $0x70] sm:$0xff] (!%p222_p10)  ;;  %v389_v31 = vld [vmem:[%s1060_s3 + $0x78] sm:$0xff] (!%p222_p10)  ;;  %v596_v33 = vld [vmem:[%s1059_s2] ss:$0 sm:$0xff] (!%p222_p10) }
  0x15   : > { %676 = vmatpush3.bf16.msra.mxu0 (!%p222_p10), %v675_v10  ;;  %v699_v32 = vpack.c.bf16 (!%p222_p10), %v389_v31, %v388_v30  ;;  %v598_v50 = vld [vmem:[%s1061_s4] ss:$0 sm:$0xff] (!%p222_p10) }
  0x16   : > { %s258_s25 = scalar_select %p257_p11, %s831_s21, 1  ;;  %682 = vmatpush3.bf16.msra.mxu1 %v681_v14 }
  0x17   : > { %683 = vmatprep.subr.bf16.mxu1 %v841_v3  ;;  %v373_v46 = vld [vmem:[#allocation2] sm:$0xff]  ;;  %s844_s21 = smov [#allocation3]  }
  0x18   : > { %s595_s27 = sshll.u32 %s258_s25, 3  ;;  %s476_s25 = scalar_lea.sflag [#allocation4], %s254_s9 }
  0x19   : > { %s260_s8 = scalar_lea.vmem %s1057_s0, %s595_s27  ;;  %s761_s27 = scalar_lea.vmem %s1011_s15, 128 }
  0x1a   : > { %v277_v11 = vld [vmem:[%s260_s8] sm:$0xff]  ;;  %685 = vmatpush3.bf16.msra.mxu1 %v684_v17  ;;  %p762_p12 = scmp.ne.s32.totalorder %s1011_s15, %s761_s27  ;;  %s765_s29 = sshll.u32 %s844_s21, 4  ;;  %s766_s29 = int_to_ptr.vmem [resolvable:$false] %s765_s29 }
  0x1b   : > { %634 = vmatmul.mubr.msk.f32.vlgmr.msra.gmra.mrb[0].mxu0 %vm275_vm1, %v277_v11  ;;  %686 = vmatprep.subr.bf16.mxu1 %v841_v3  ;;  %s767_s7 = scalar_lea.vmem %s766_s29, 256  ;;  %p768_p1 = scmp.lt.s32.totalorder %s1011_s15, %s766_s29 }
  0x1c   : > { %p763_p13 = pnand %p762_p12, %p915_p4  ;;  %p769_p2 = scmp.lt.s32.totalorder %s767_s7, %s761_s27 }
  0x1e   : > { %688 = vmatpush3.bf16.msra.mxu1 %v687_v20  ;;  %p764_p0 = pneg %p763_p13  ;;  %p770_p3 = por %p769_p2, %p768_p1 }
  0x1f   : > { %689 = vmatprep.subr.bf16.mxu1 %v841_v3 }
  0x20   : > { %p771_p5 = pnand %p770_p3, %p764_p0 }
  0x22   : > { %691 = vmatpush3.bf16.msra.mxu1 %v690_v23 }
  0x23   : > { %692 = vmatprep.subr.bf16.mxu1 %v841_v3 }
  0x26   : > { %694 = vmatpush3.bf16.msra.mxu1 %v693_v26 }
  0x27   : > { %695 = vmatprep.subr.bf16.mxu1 %v841_v3 }
  0x2a   : > { %697 = vmatpush3.bf16.msra.mxu1 %v696_v29 }
  0x2b   : > { %698 = vmatprep.subr.bf16.mxu1 %v841_v3 }
  0x2e   : > { %700 = vmatpush3.bf16.msra.mxu1 %v699_v32 }
  0xee   : > { %v360_v34 = vpop.f32.mrb[0].mxu0 }
  0xef   : > { %v361_v35 = vadd.f32 %v596_v33, %v360_v34  ;;  %v635_v36 = vpop.f32.mrb[1].mxu0 }
  0xf1   : > { %v364_v37 = vmul.f32 %v361_v35, %v361_v35 }
  0xf3   : > { %v365_v38 = vmul.f32 %v364_v37, %v361_v35 }
  0xf5   : > { %v366_v39 = vmul.f32 0.044715, %v365_v38 }
  0xf7   : > { %v367_v40 = vadd.f32 %v366_v39, %v361_v35 }
  0xf9   : > { %v368_v41 = vmul.f32 0.7978846, %v367_v40 }
  0xfb   : > { %759 = vtanh.f32 %v368_v41 }
 0x105   : > { %v760_v42 = vpop.eup %759 }
 0x106   : > { %v370_v43 = vadd.f32 1.0, %v760_v42 }
 0x108   : > { %v371_v44 = vmul.f32 0.5, %v370_v43 }
 0x10a   : > { %v372_v45 = vmul.f32 %v371_v44, %v361_v35 }
 0x10c   : > { %669 = vmatmul.mubr.f32.vlgmr.msra.gmra.mrb[0].mxu1 %v372_v45 }
 0x1df   : > { %v456_v47 = vpop.f32.mrb[0].mxu1 }
 0x1e0   : > { %v460_v48 = vadd.f32 %v456_v47, %v373_v46  ;;  %v670_v49 = vpop.f32.mrb[1].mxu1 }
 0x1e2   : > { %461 = vst.msk [vmem:[#allocation2] sm:$0xff] %vm275_vm1, %v460_v48 }
 0x1e9   : > { %v465_v51 = vld [vmem:[#allocation2] sm:$0xff] }
 0x1ea   : > { %v473_v52 = vadd.f32 %v598_v50, %v465_v51 }
 0x1ec   : > { %474 = vst.msk [vmem:[%s256_s14] sm:$0xff] %vm275_vm1, %v473_v52 }
 0x1ed   : > { %774 = shalt.err (!%p771_p5)
}
 0x1ee   : > { %s775_s8 = scalar_lea.hbm %s1009_s24, 128  ;;  %s779_s11 = scalar_lea.hbm %s1062_s5, 256 }
 0x1ef   : > { %p776_p6 = scmp.ne.s32.totalorder %s1009_s24, %s775_s8  ;;  %p780_p10 = scmp.lt.u32.totalorder %s1009_s24, %s1062_s5 }
 0x1f0   : > { %p781_p11 = scmp.lt.u32.totalorder %s779_s11, %s775_s8  ;;  %p783_p13 = scmp.lt.u32.totalorder %s775_s8, %s1009_s24 }
 0x1f1   : > { %p777_p7 = pnand %p776_p6, %p915_p4 }
 0x1f2   : > { %p782_p12 = por %p781_p11, %p780_p10 }
 0x1f3   : > { %p778_p9 = pneg %p777_p7 }
 0x1f4   : > { %p784_p0 = por %p783_p13, %p782_p12 }
 0x1f6   : > { %p785_p1 = pnand %p784_p0, %p778_p9 }
 0x1f8   : > { %788 = shalt.err (!%p785_p1)
}
 0x1f9   : > { %701 = dma.vmem_to_hbm [thread:$0]  (%p915_p4), %s1011_s15, 128, %s1009_s24, %s476_s25  }
 0x1fa PF: > { %p707_p2 = scmp.ge.s32.totalorder %s839_s23, 2  ;;  %s501_s14 = sand.u32 1, %s819_s18  }
 0x1fb   : > { %s502_s16 = scalar_lea.sflag [#allocation4], %s501_s14 }
 0x1fc   : > { %p704_p3 = pnand %p707_p2, %p922_p8 }
 0x1fe   : > { %814 = dma.done.wait (!%p704_p3), %s502_s16, 128  }
 0x1ff   : > { %816 = vsyncadd (!%p704_p3), %s502_s16, 4294967168  ;;  %s18_s23 = sadd.s32 1, %s839_s23   ;;  %s1065_s18 = smov %s823_s19 }
 0x200   : > { %p15_p5 = scmp.ge.s32.totalorder %s18_s23, 4   ;;  %s1066_s19 = smov %s827_s20 }
 0x201   : > { %s1067_s20 = smov %s928_s6  ;;  %s1068_s21 = smov %s835_s22 }
 0x202   : > { %s1069_s22 = smov %s1071_s26  ;;  %17 = sbr.rel (!%p15_p5) target bundleno = 4 (0x4), region = 90 }
 0x209   :  { %507 = vsyncpa [#allocation4], 1 }
 0x20a   :  { %509 = vsyncpa [#allocation4 + $0x1], 1 }

</bundles_post_ra>
